<compile_context>
chip_gen: v7x
topology: tpu7x:2x2x1
jax: 0.10.0
libtpu: 0.0.40
codegen_flags: <defaults>
</compile_context>

<pallas_src>
import jax
import jax.numpy as jnp
import numpy as np
from jax import lax
from jax.experimental import pallas as pl
from jax.experimental.pallas import tpu as pltpu

# ----------------------------- problem sizes -----------------------------
B = 2                  # batch (len(x_hs))
S = 16                 # padded query length
BS = B * S             # batch folded into sublanes -> 32 rows
H = 32                 # hidden_size (embedding dim)
V = 128                # vocab size
TEMPLATE = (3, 3, 0)
SPELL = sum(TEMPLATE)  # 6
P_PAD = 8              # spell_length padded to a sublane multiple

# synthetic special-token ids
PAD_ID, UNK_ID, CLS_ID, SEP_ID, MASK_ID, DOT_ID, PSEUDO_ID = 0, 1, 2, 3, 4, 5, 6


# ============================ fused Pallas kernel ==========================

def ptune_fused_kernel(qlab_ref, emb_ref, pin_ref, w_ref, lwo_ref, b_ref,
                       logits_ref, loss_ref):
    """PromptEncoder MLP + embedding gather (prompt injection folded in) +
    LM head + masked cross-entropy, all in one VMEM-resident step."""
    # ---- unpack the packed parameter slabs (static slices, zero cost) ----
    pw1 = w_ref[0 * H:1 * H, :]            # (H, H) bf16
    pw2 = w_ref[1 * H:2 * H, :]            # (H, H) bf16
    lw1 = w_ref[2 * H:3 * H, :]            # (H, H) bf16
    bvec = b_ref[...]                      # (4, 128) f32
    pb1 = bvec[0:1, :H]
    pb2 = bvec[1:2, :H]
    lb1 = bvec[2:3, :H]
    lbo = bvec[3:4, :]

    # ---- PromptEncoder head ----
    # TODO(synk): original PromptEncoder also has a bi-LSTM before the MLP;
    # only the MLP head is implemented here.
    h = jnp.dot(pin_ref[...], pw1, preferred_element_type=jnp.float32)
    h = jnp.maximum(h + pb1, 0.0)
    pe = jnp.dot(h.astype(jnp.bfloat16), pw2,
                 preferred_element_type=jnp.float32) + pb2          # (P_PAD, H) f32

    # ---- embedding gather: two lane-aligned one-hot matmuls ----
    q = qlab_ref[:, 0:1]                                            # (BS, 1) int32
    lab = qlab_ref[:, 1:2]                                          # (BS, 1) int32

    vid = lax.broadcasted_iota(jnp.int32, (BS, V), 1)
    oh_v = (q == vid).astype(jnp.bfloat16)                          # (BS, 128)
    pid = lax.broadcasted_iota(jnp.int32, (BS, P_PAD), 1)
    oh_p = ((q - V) == pid).astype(jnp.bfloat16)                    # (BS, 8)

    x = (jnp.dot(oh_v, emb_ref[...], preferred_element_type=jnp.float32)
         + jnp.dot(oh_p, pe.astype(jnp.bfloat16),
                   preferred_element_type=jnp.float32))             # (BS, H) f32

    # ---- LM head ----
    # TODO(synk): the pretrained BERT/GPT transformer stack is replaced by a
    # single MLP LM head; attention_mask is therefore unused.
    h2 = jnp.dot(x.astype(jnp.bfloat16), lw1, preferred_element_type=jnp.float32)
    h2 = jnp.maximum(h2 + lb1, 0.0)
    logits = jnp.dot(h2.astype(jnp.bfloat16), lwo_ref[...],
                     preferred_element_type=jnp.float32) + lbo      # (BS, V) f32
    logits_ref[...] = logits

    # ---- masked cross-entropy (ignore_index = -100), mean over valid rows ----
    lid = lax.broadcasted_iota(jnp.int32, (BS, V), 1)
    onehot_l = (lab == lid).astype(jnp.float32)   # all-zero row where label == -100
    valid = (lab >= 0).astype(jnp.float32)                          # (BS, 1)

    m = jnp.max(logits, axis=-1, keepdims=True)
    lse = m + jnp.log(jnp.sum(jnp.exp(logits - m), axis=-1, keepdims=True))
    lab_logit = jnp.sum(onehot_l * logits, axis=-1, keepdims=True)
    nll = (lse - lab_logit) * valid                                 # (BS, 1)

    # scalar loss leaves through SMEM (cheap scalar path, no padded VMEM tile)
    loss_ref[0, 0] = jnp.sum(nll) / jnp.maximum(jnp.sum(valid), 1.0)


# ============================ wrapper ======================================

def run_ptune_forward(qlab, emb_table, prompt_in, w_pack, lm_wo, b_pack):
    """Single-launch fused forward.  No grid: whole working set lives in VMEM."""
    logits, loss = pl.pallas_call(
        ptune_fused_kernel,
        out_shape=[
            jax.ShapeDtypeStruct((BS, V), jnp.float32),   # lane-dense logits
            jax.ShapeDtypeStruct((1, 1), jnp.float32),    # scalar loss
        ],
        out_specs=[
            pl.BlockSpec(memory_space=pltpu.MemorySpace.VMEM),
            pl.BlockSpec(memory_space=pltpu.MemorySpace.SMEM),
        ],
    )(qlab, emb_table, prompt_in, w_pack, lm_wo, b_pack)
    return logits.reshape(B, S, V), loss[0, 0]


# ============================ main / forward ===============================

if __name__ == "__main__":
    key = jax.random.PRNGKey(0)
    ks = jax.random.split(key, 12)

    # deterministic parameters (synthetic "checkpoint")
    emb_table = 0.02 * jax.random.normal(ks[0], (V, H), jnp.float32)
    prompt_in = 0.02 * jax.random.normal(ks[1], (P_PAD, H), jnp.float32)
    pe_w1 = 0.1 * jax.random.normal(ks[2], (H, H), jnp.float32)
    pe_b1 = jnp.zeros((1, H), jnp.float32)
    pe_w2 = 0.1 * jax.random.normal(ks[3], (H, H), jnp.float32)
    pe_b2 = jnp.zeros((1, H), jnp.float32)
    lm_w1 = 0.1 * jax.random.normal(ks[4], (H, H), jnp.float32)
    lm_b1 = jnp.zeros((1, H), jnp.float32)
    lm_wo = 0.1 * jax.random.normal(ks[5], (H, V), jnp.float32)
    lm_bo = jnp.zeros((1, V), jnp.float32)

    # ---- pack parameters: MXU operands in bf16, biases in one f32 slab ----
    w_pack = jnp.concatenate([pe_w1, pe_w2, lm_w1], axis=0).astype(jnp.bfloat16)  # (96, 32)
    b_pack = jnp.zeros((4, V), jnp.float32)
    b_pack = b_pack.at[0, :H].set(pe_b1[0])
    b_pack = b_pack.at[1, :H].set(pe_b2[0])
    b_pack = b_pack.at[2, :H].set(lm_b1[0])
    b_pack = b_pack.at[3, :].set(lm_bo[0])
    emb_bf = emb_table.astype(jnp.bfloat16)
    pin_bf = prompt_in.astype(jnp.bfloat16)
    lwo_bf = lm_wo.astype(jnp.bfloat16)

    # -------- get_query: [CLS] [P]*3 [MASK] [P]*3 x_h . [SEP], padded --------
    # TODO(synk): tokenizer / string handling has no Pallas equivalent;
    #             synthetic token ids are used instead.
    rng = np.random.RandomState(0)
    queries_np = np.full((B, S), PAD_ID, dtype=np.int32)
    for i in range(B):
        xh_toks = list(rng.randint(10, V, size=3))
        q = ([CLS_ID] + [PSEUDO_ID] * TEMPLATE[0] + [MASK_ID]
             + [PSEUDO_ID] * TEMPLATE[1] + xh_toks + [DOT_ID] + [SEP_ID])
        queries_np[i, :len(q)] = np.asarray(q, dtype=np.int32)
    label_ids_np = rng.randint(10, V, size=(B, 1)).astype(np.int32)

    # Fold the prompt-embedding scatter into the gather: remap the i-th pseudo
    # token of each query to extended id V+i so the prompt one-hot matmul
    # directly selects the prompt-encoder output row.
    is_pseudo = queries_np == PSEUDO_ID
    prompt_idx = np.cumsum(is_pseudo, axis=1) - 1
    q_ext_np = np.where(is_pseudo, V + prompt_idx, queries_np).astype(np.int32)

    # labels: -100 everywhere except the [MASK] position (bert_out path)
    labels_np = np.full((B, S), -100, dtype=np.int32)
    mask_pos = np.argmax(queries_np == MASK_ID, axis=1)
    labels_np[np.arange(B), mask_pos] = label_ids_np[:, 0]

    # batch folded into the sublane dimension; ids + labels packed into one
    # (BS, 2) int32 operand to cut input-DMA count.
    qlab_np = np.stack([q_ext_np.reshape(BS), labels_np.reshape(BS)], axis=1)
    qlab = jnp.asarray(qlab_np, dtype=jnp.int32)                     # (BS, 2)
    label_ids = jnp.asarray(label_ids_np)

    # -------- fused forward (one pallas_call, no grid) --------
    logits, loss = run_ptune_forward(qlab, emb_bf, pin_bf, w_pack, lwo_bf, b_pack)

    # hit@1 (allowed_vocab_ids == full vocab for the synthetic setup, so the
    # first allowed prediction is simply the argmax at the [MASK] position)
    flat_mask = jnp.asarray(np.arange(B) * S + mask_pos)
    mask_logits = logits.reshape(BS, V)[flat_mask]                   # (B, V)
    preds = jnp.argmax(mask_logits, axis=-1)
    hit1 = jnp.sum((preds == label_ids[:, 0]).astype(jnp.int32))

    loss = jax.block_until_ready(loss)
    hit1 = jax.block_until_ready(hit1)
    logits = jax.block_until_ready(logits)
    assert np.isfinite(float(loss))
    print("KERNEL_OK")
</pallas_src>

<mosaic_0001>
module attributes {stable_mosaic.version = 11 : i64} {
  func.func @ptune_fused_kernel(%arg0: memref<32x2xi32, #tpu.memory_space<vmem>>, %arg1: memref<128x32xbf16, #tpu.memory_space<vmem>>, %arg2: memref<8x32xbf16, #tpu.memory_space<vmem>>, %arg3: memref<96x32xbf16, #tpu.memory_space<vmem>>, %arg4: memref<32x128xbf16, #tpu.memory_space<vmem>>, %arg5: memref<4x128xf32, #tpu.memory_space<vmem>>, %arg6: memref<32x128xf32, #tpu.memory_space<vmem>>, %arg7: memref<1x1xf32, #tpu.memory_space<smem>>) attributes {dimension_semantics = [], scalar_prefetch = 0 : i64, scratch_operands = 0 : i64, tpu.core_type = #tpu.core_type<tc>} {
    %c0 = arith.constant 0 : index
    %c0_0 = arith.constant 0 : index
    %0 = vector.load %arg3[%c0, %c0_0] : memref<96x32xbf16, #tpu.memory_space<vmem>>, vector<32x32xbf16>
    %c32 = arith.constant 32 : index
    %c0_1 = arith.constant 0 : index
    %1 = vector.load %arg3[%c32, %c0_1] : memref<96x32xbf16, #tpu.memory_space<vmem>>, vector<32x32xbf16>
    %c64 = arith.constant 64 : index
    %c0_2 = arith.constant 0 : index
    %2 = vector.load %arg3[%c64, %c0_2] : memref<96x32xbf16, #tpu.memory_space<vmem>>, vector<32x32xbf16>
    %c0_3 = arith.constant 0 : index
    %c0_4 = arith.constant 0 : index
    %3 = vector.load %arg5[%c0_3, %c0_4] : memref<4x128xf32, #tpu.memory_space<vmem>>, vector<4x128xf32>
    %4 = vector.extract_strided_slice %3 {offsets = [0, 0], sizes = [1, 32], strides = [1, 1]} : vector<4x128xf32> to vector<1x32xf32>
    %5 = vector.extract_strided_slice %3 {offsets = [1, 0], sizes = [1, 32], strides = [1, 1]} : vector<4x128xf32> to vector<1x32xf32>
    %6 = vector.extract_strided_slice %3 {offsets = [2, 0], sizes = [1, 32], strides = [1, 1]} : vector<4x128xf32> to vector<1x32xf32>
    %7 = vector.extract_strided_slice %3 {offsets = [3, 0], sizes = [1, 128], strides = [1, 1]} : vector<4x128xf32> to vector<1x128xf32>
    %c0_5 = arith.constant 0 : index
    %c0_6 = arith.constant 0 : index
    %8 = vector.load %arg2[%c0_5, %c0_6] : memref<8x32xbf16, #tpu.memory_space<vmem>>, vector<8x32xbf16>
    %cst = arith.constant dense<0.000000e+00> : vector<8x32xf32>
    %9 = tpu.matmul %8, %0, %cst {dimension_numbers = #tpu.dot_dimension_numbers<[1], [0], [0], [1], [0, 0, 1, 1], [], []>} : vector<8x32xbf16>, vector<32x32xbf16>, vector<8x32xf32> -> vector<8x32xf32>
    %10 = vector.broadcast %4 : vector<1x32xf32> to vector<8x32xf32>
    %11 = arith.addf %9, %10 : vector<8x32xf32>
    %cst_7 = arith.constant 0.000000e+00 : f32
    %12 = vector.broadcast %cst_7 : f32 to vector<8x32xf32>
    %13 = arith.maximumf %11, %12 : vector<8x32xf32>
    %14 = arith.truncf %13 : vector<8x32xf32> to vector<8x32xbf16>
    %cst_8 = arith.constant dense<0.000000e+00> : vector<8x32xf32>
    %15 = tpu.matmul %14, %1, %cst_8 {dimension_numbers = #tpu.dot_dimension_numbers<[1], [0], [0], [1], [0, 0, 1, 1], [], []>} : vector<8x32xbf16>, vector<32x32xbf16>, vector<8x32xf32> -> vector<8x32xf32>
    %16 = vector.broadcast %5 : vector<1x32xf32> to vector<8x32xf32>
    %17 = arith.addf %15, %16 : vector<8x32xf32>
    %c0_9 = arith.constant 0 : index
    %c0_10 = arith.constant 0 : index
    %18 = vector.load %arg0[%c0_9, %c0_10] : memref<32x2xi32, #tpu.memory_space<vmem>>, vector<32x1xi32>
    %c0_11 = arith.constant 0 : index
    %c1 = arith.constant 1 : index
    %19 = vector.load %arg0[%c0_11, %c1] : memref<32x2xi32, #tpu.memory_space<vmem>>, vector<32x1xi32>
    %20 = tpu.iota {dimensions = array<i32: 1>} : vector<32x128xi32>
    %21 = vector.broadcast %18 : vector<32x1xi32> to vector<32x128xi32>
    %22 = arith.cmpi eq, %21, %20 : vector<32x128xi32>
    %23 = arith.extui %22 : vector<32x128xi1> to vector<32x128xi32>
    %24 = arith.sitofp %23 : vector<32x128xi32> to vector<32x128xf32>
    %25 = arith.truncf %24 : vector<32x128xf32> to vector<32x128xbf16>
    %26 = tpu.iota {dimensions = array<i32: 1>} : vector<32x8xi32>
    %c128_i32 = arith.constant 128 : i32
    %27 = vector.broadcast %c128_i32 : i32 to vector<32x1xi32>
    %28 = arith.subi %18, %27 : vector<32x1xi32>
    %29 = vector.broadcast %28 : vector<32x1xi32> to vector<32x8xi32>
    %30 = arith.cmpi eq, %29, %26 : vector<32x8xi32>
    %31 = arith.extui %30 : vector<32x8xi1> to vector<32x8xi32>
    %32 = arith.sitofp %31 : vector<32x8xi32> to vector<32x8xf32>
    %33 = arith.truncf %32 : vector<32x8xf32> to vector<32x8xbf16>
    %c0_12 = arith.constant 0 : index
    %c0_13 = arith.constant 0 : index
    %34 = vector.load %arg1[%c0_12, %c0_13] : memref<128x32xbf16, #tpu.memory_space<vmem>>, vector<128x32xbf16>
    %cst_14 = arith.constant dense<0.000000e+00> : vector<32x32xf32>
    %35 = tpu.matmul %25, %34, %cst_14 {dimension_numbers = #tpu.dot_dimension_numbers<[1], [0], [0], [1], [0, 0, 1, 1], [], []>} : vector<32x128xbf16>, vector<128x32xbf16>, vector<32x32xf32> -> vector<32x32xf32>
    %36 = arith.truncf %17 : vector<8x32xf32> to vector<8x32xbf16>
    %cst_15 = arith.constant dense<0.000000e+00> : vector<32x32xf32>
    %37 = tpu.matmul %33, %36, %cst_15 {dimension_numbers = #tpu.dot_dimension_numbers<[1], [0], [0], [1], [0, 0, 1, 1], [], []>} : vector<32x8xbf16>, vector<8x32xbf16>, vector<32x32xf32> -> vector<32x32xf32>
    %38 = arith.addf %35, %37 : vector<32x32xf32>
    %39 = arith.truncf %38 : vector<32x32xf32> to vector<32x32xbf16>
    %cst_16 = arith.constant dense<0.000000e+00> : vector<32x32xf32>
    %40 = tpu.matmul %39, %2, %cst_16 {dimension_numbers = #tpu.dot_dimension_numbers<[1], [0], [0], [1], [0, 0, 1, 1], [], []>} : vector<32x32xbf16>, vector<32x32xbf16>, vector<32x32xf32> -> vector<32x32xf32>
    %41 = vector.broadcast %6 : vector<1x32xf32> to vector<32x32xf32>
    %42 = arith.addf %40, %41 : vector<32x32xf32>
    %cst_17 = arith.constant 0.000000e+00 : f32
    %43 = vector.broadcast %cst_17 : f32 to vector<32x32xf32>
    %44 = arith.maximumf %42, %43 : vector<32x32xf32>
    %45 = arith.truncf %44 : vector<32x32xf32> to vector<32x32xbf16>
    %c0_18 = arith.constant 0 : index
    %c0_19 = arith.constant 0 : index
    %46 = vector.load %arg4[%c0_18, %c0_19] : memref<32x128xbf16, #tpu.memory_space<vmem>>, vector<32x128xbf16>
    %cst_20 = arith.constant dense<0.000000e+00> : vector<32x128xf32>
    %47 = tpu.matmul %45, %46, %cst_20 {dimension_numbers = #tpu.dot_dimension_numbers<[1], [0], [0], [1], [0, 0, 1, 1], [], []>} : vector<32x32xbf16>, vector<32x128xbf16>, vector<32x128xf32> -> vector<32x128xf32>
    %48 = vector.broadcast %7 : vector<1x128xf32> to vector<32x128xf32>
    %49 = arith.addf %47, %48 : vector<32x128xf32>
    %c0_21 = arith.constant 0 : index
    %c0_22 = arith.constant 0 : index
    %50 = vector.load %arg6[%c0_21, %c0_22] : memref<32x128xf32, #tpu.memory_space<vmem>>, vector<32x128xf32>
    tpu.vector_store %arg6[%c0_21, %c0_22], %49 {strides = array<i32>} : memref<32x128xf32, #tpu.memory_space<vmem>>, vector<32x128xf32>,
    %51 = tpu.iota {dimensions = array<i32: 1>} : vector<32x128xi32>
    %52 = vector.broadcast %19 : vector<32x1xi32> to vector<32x128xi32>
    %53 = arith.cmpi eq, %52, %51 : vector<32x128xi32>
    %54 = arith.extui %53 : vector<32x128xi1> to vector<32x128xi32>
    %55 = arith.sitofp %54 : vector<32x128xi32> to vector<32x128xf32>
    %c0_i32 = arith.constant 0 : i32
    %56 = vector.broadcast %c0_i32 : i32 to vector<32x1xi32>
    %57 = arith.cmpi sge, %19, %56 : vector<32x1xi32>
    %58 = arith.extui %57 : vector<32x1xi1> to vector<32x1xi32>
    %59 = arith.sitofp %58 : vector<32x1xi32> to vector<32x1xf32>
    %cst_23 = arith.constant dense<0xFF800000> : vector<32xf32>
    %60 = vector.multi_reduction <maximumf>, %49, %cst_23 [1] : vector<32x128xf32> to vector<32xf32>
    %61 = vector.shape_cast %60 : vector<32xf32> to vector<32x1xf32>
    %62 = vector.broadcast %61 : vector<32x1xf32> to vector<32x128xf32>
    %63 = arith.subf %49, %62 : vector<32x128xf32>
    %64 = math.exp %63 : vector<32x128xf32>
    %cst_24 = arith.constant dense<0.000000e+00> : vector<32xf32>
    %65 = vector.multi_reduction <add>, %64, %cst_24 [1] : vector<32x128xf32> to vector<32xf32>
    %66 = vector.shape_cast %65 : vector<32xf32> to vector<32x1xf32>
    %67 = math.log %66 : vector<32x1xf32>
    %68 = arith.addf %61, %67 : vector<32x1xf32>
    %69 = arith.mulf %55, %49 : vector<32x128xf32>
    %cst_25 = arith.constant dense<0.000000e+00> : vector<32xf32>
    %70 = vector.multi_reduction <add>, %69, %cst_25 [1] : vector<32x128xf32> to vector<32xf32>
    %71 = vector.shape_cast %70 : vector<32xf32> to vector<32x1xf32>
    %72 = arith.subf %68, %71 : vector<32x1xf32>
    %73 = arith.mulf %72, %59 : vector<32x1xf32>
    %74 = vector.shape_cast %73 : vector<32x1xf32> to vector<1x32x1xf32>
    %cst_26 = arith.constant dense<0.000000e+00> : vector<1xf32>
    %75 = vector.multi_reduction <add>, %74, %cst_26 [1, 2] : vector<1x32x1xf32> to vector<1xf32>
    %76 = vector.shape_cast %75 : vector<1xf32> to vector<1x1x1xf32>
    %77 = vector.extract %76[0, 0, 0] : f32 from vector<1x1x1xf32>
    %78 = vector.shape_cast %59 : vector<32x1xf32> to vector<1x32x1xf32>
    %cst_27 = arith.constant dense<0.000000e+00> : vector<1xf32>
    %79 = vector.multi_reduction <add>, %78, %cst_27 [1, 2] : vector<1x32x1xf32> to vector<1xf32>
    %80 = vector.shape_cast %79 : vector<1xf32> to vector<1x1x1xf32>
    %81 = vector.extract %80[0, 0, 0] : f32 from vector<1x1x1xf32>
    %cst_28 = arith.constant 1.000000e+00 : f32
    %82 = arith.maximumf %81, %cst_28 : f32
    %83 = arith.divf %77, %82 : f32
    %c0_29 = arith.constant 0 : index
    %c0_30 = arith.constant 0 : index
    %84 = memref.load %arg7[%c0_29, %c0_30] : memref<1x1xf32, #tpu.memory_space<smem>>
    memref.store %83, %arg7[%c0_29, %c0_30] : memref<1x1xf32, #tpu.memory_space<smem>>
    return
  }
}

</mosaic_0001>

<bundles_post_ra>
// kernel: tpu_custom_call.1
= control target key start
LH: loop header
LB: loop body
LE: loop exit
PB: predicated region body
PF: predicated region fallthrough
CT: control target
= control target key end

     0   :  { %13 = vsyncpa [#allocation3], 0  ;;  %v988_v1 = vmov 0.0   ;;  %vm989_vm0 = vmmov 0   ;;  %vm58_vm1 = vcmask 261120   ;;  %s1236_s0 = inlined_call_operand.vmem [shape: s32[32,2], index: 0, kind: input, shape index: {}]   ;;  %s1237_s1 = inlined_call_operand.vmem [shape: bf16[128,32], index: 1, kind: input, shape index: {}]   ;;  %s1238_s2 = inlined_call_operand.vmem [shape: bf16[8,32], index: 2, kind: input, shape index: {}]   ;;  %s1239_s3 = inlined_call_operand.vmem [shape: bf16[96,32], index: 3, kind: input, shape index: {}]   ;;  %s1240_s4 = inlined_call_operand.vmem [shape: bf16[32,128], index: 4, kind: input, shape index: {}]   ;;  %s1241_s5 = inlined_call_operand.vmem [shape: f32[4,128], index: 5, kind: input, shape index: {}]   ;;  %s1242_s6 = inlined_call_operand.hbm [shape: f32[32,128], index: 6, kind: output, shape index: {0}]   ;;  %s1243_s7 = inlined_call_operand.hbm [shape: f32[1,1], index: 7, kind: output, shape index: {1}]  }
   0x1   :  { %v918_v0 = vld [vmem:[%s1239_s3] sm:$0xff]   ;;  %829 = vmatprep.subr.bf16.mxu1 %v988_v1  ;;  %v919_v2 = vld [vmem:[%s1239_s3 + $0x8] sm:$0xff]   ;;  %833 = vmatprep.mubr.msk.bf16.mxu1 %vm989_vm0, %v988_v1  ;;  %v920_v4 = vld [vmem:[%s1239_s3 + $0x10] sm:$0xff]  }
   0x2   :  { %830 = vmatpush3.bf16.msra.mxu1 %v918_v0  ;;  %v41_v3 = vld [vmem:[%s1238_s2] sm:$0xf] }
   0x3   :  { %831 = vmatprep.subr.bf16.mxu1 %v988_v1 }
   0x6   :  { %832 = vmatpush3.bf16.msra.mxu1 %v919_v2 }
   0x7   :  { %837 = vmatprep.subr.bf16.mxu1 %v988_v1 }
   0x9   :  { %834 = vmatmul.mubr.msk.bf16.vlgmr.msra.gmra.mrb[0].mxu1 %vm58_vm1, %v41_v3 }
   0xa   :  { %838 = vmatpush3.bf16.msra.mxu1 %v920_v4  ;;  %841 = vmatprep.mubr.msk.bf16.mxu1 %vm989_vm0, %v988_v1 }
   0xb   :  { %839 = vmatprep.subr.bf16.mxu1 %v988_v1 }
   0xc   :  { %14 = vsyncpa [#allocation4], 0  ;;  %v921_v5 = vld [vmem:[%s1239_s3 + $0x18] sm:$0xff]   ;;  %v1064_v6 = vld [vmem:[%s1236_s0 + $0x10] sm:$0xff]  ;;  %v990_v9 = vmov 0   ;;  %v42_v15 = vlaneseq  ;;  %vm242_vm4 = vcmask 64512  }
   0xd   :  { %v1069_v7 = vld [vmem:[%s1236_s0] sm:$0xff]  ;;  %v1074_v8 = vld [vmem:[%s1236_s0 + $0x18] sm:$0xff]  ;;  %910 = vset.pattern.permute.xlu1 %v990_v9  ;;  %909 = vset.pattern.permute.xlu0 %v990_v9  ;;  %v766_v10 = vadd.s32 4294967168, %v1064_v6  ;;  %v1081_v12 = vld [vmem:[%s1236_s0 + $0x8] sm:$0xff]  ;;  %vm249_vm7 = vcmask 1043456   ;;  %s994_s16 = smov [#allocation2]  }
   0xe   :  { %840 = vmatpush3.bf16.msra.mxu1 %v921_v5  ;;  %v764_v11 = vadd.s32 4294967168, %v1069_v7  ;;  %v767_v13 = vadd.s32 4294967168, %v1074_v8  ;;  %v765_v14 = vadd.s32 4294967168, %v1081_v12  ;;  %v1089_v16 = vshrl.u32 %v42_v15, 7  ;;  %v1095_v18 = vld [vmem:[%s1241_s5] sm:$0xf] }
   0xf   :  { %206 = vperm.xlu1 %910, %v766_v10   ;;  %v1099_v28 = vand.u32 127, %v42_v15  ;;  %v930_v33 = vld [vmem:[%s1239_s3 + $0x20] sm:$0xff]   ;;  %v923_v51 = vld [vmem:[%s1237_s1 + $0x8] sm:$0xff]   ;;  %v991_v52 = vmov 1.0|1.0   ;;  %v924_v53 = vld [vmem:[%s1237_s1 + $0x10] sm:$0xff]  }
  0x10   :  { %200 = vperm.xlu0 %909, %v764_v11   ;;  %v44_v17 = vsub.s32 0, %v1089_v16  ;;  %871 = vmatprep.subr.bf16.mxu1 %v930_v33  ;;  %v106_v35 = vsub.s32 1, %v1089_v16  ;;  %v922_v44 = vld [vmem:[%s1237_s1] sm:$0xff]   ;;  %v925_v54 = vld [vmem:[%s1237_s1 + $0x18] sm:$0xff]   ;;  %v927_v56 = vld [vmem:[%s1237_s1 + $0x28] sm:$0xff]   ;;  %v992_v10 = vmov 1  }
  0x11   :  { %v926_v55 = vld [vmem:[%s1237_s1 + $0x20] sm:$0xff]   ;;  %v928_v57 = vld [vmem:[%s1237_s1 + $0x30] sm:$0xff]   ;;  %v929_v58 = vld [vmem:[%s1237_s1 + $0x38] sm:$0xff]   ;;  %v403_v11 = vsub.s32 2, %v1089_v16  ;;  %s730_s17 = sshll.u32 %s994_s16, 4  ;;  %s731_s17 = int_to_ptr.vmem [resolvable:$true] %s730_s17 }
  0x12   :  { %v45_v19 = vrot.slane %v1095_v18, %v44_v17  ;;  %v107_v36 = vrot.slane %v1095_v18, %v106_v35  ;;  %v931_v61 = vld [vmem:[%s1239_s3 + $0x28] sm:$0xff]   ;;  %v932_v5 = vld [vmem:[%s1240_s4] sm:$0xff]   ;;  %s952_s0 = scalar_lea.vmem %s731_s17, 512  ;;  %p957_p1 = scmp.lt.s32.totalorder %s731_s17, %s731_s17 }
  0x13   :  { %209 = vperm.xlu1 %910, %v767_v13   ;;  %v933_v9 = vld [vmem:[%s1240_s4 + $0x8] sm:$0xff]   ;;  %v404_v13 = vrot.slane %v1095_v18, %v403_v11  ;;  %s993_s4 = smov 127   ;;  %p953_p0 = scmp.ne.s32.totalorder %s731_s17, %s952_s0 }
  0x14   :  { %203 = vperm.xlu0 %909, %v765_v14   ;;  %p958_p2 = scmp.lt.s32.totalorder %s952_s0, %s952_s0 }
  0x16   :  { %p959_p3 = por %p958_p2, %p957_p1 }
  0x17   :  { %173 = vperm.xlu1 %910, %v1081_v12  }
  0x18   :  { %170 = vperm.xlu0 %909, %v1069_v7   ;;  %p960_p4 = pnand %p959_p3, %p953_p0 }
  0x1b   :  { %179 = vperm.xlu1 %910, %v1074_v8  }
  0x1c   :  { %176 = vperm.xlu0 %909, %v1064_v6  }
  0x1f   :  { %911 = vset.pattern.permute.xlu1 %v992_v10 }
  0x20   :  { %912 = vset.pattern.permute.xlu0 %v992_v10  ;;  %558 = vperm.xlu1 %911, %v1069_v7  }
  0x8e   :  { %v207_v34 = vpop.permute.xlu1 %206 }
  0x8f   :  { %v201_v27 = vpop.permute.xlu0 %200  ;;  %vm213_vm5 = vcmp.eq.s32.totalorder %v207_v34, %v1099_v28 }
  0x90   :  { %vm211_vm2 = vcmp.eq.s32.totalorder %v201_v27, %v1099_v28  ;;  %v770_v45 = vsel %vm213_vm5, 1.0, %v988_v1  ;;  %vm584_vm5 = vcmp.ge.s32.totalorder %v1074_v8, 0 }
  0x91   :  { %v768_v30 = vsel %vm211_vm2, 1.0, %v988_v1  ;;  %vm581_vm2 = vcmp.ge.s32.totalorder %v1069_v7, 0 }
  0x92   :  { %v210_v37 = vpop.permute.xlu1 %209 }
  0x93   :  { %v204_v29 = vpop.permute.xlu0 %203  ;;  %vm214_vm6 = vcmp.eq.s32.totalorder %v210_v37, %v1099_v28 }
  0x94   :  { %vm212_vm3 = vcmp.eq.s32.totalorder %v204_v29, %v1099_v28  ;;  %v771_v46 = vsel %vm214_vm6, 1.0, %v988_v1  ;;  %vm669_vm6 = vcmask 7168  }
  0x95   :  { %v769_v31 = vsel %vm212_vm3, 1.0, %v988_v1  ;;  %v224_v50 = vpack.c.bf16 %v771_v46, %v770_v45  ;;  %vm582_vm3 = vcmp.ge.s32.totalorder %v1081_v12, 0 }
  0x96   :  { %v223_v32 = vpack.c.bf16 %v769_v31, %v768_v30  ;;  %v174_v47 = vpop.permute.xlu1 %173  ;;  %v484_v31 = vsub.s32 3, %v1089_v16 }
  0x97   :  { %v171_v48 = vpop.permute.xlu0 %170  ;;  %vm182_vm8 = vcmp.eq.s32.totalorder %v174_v47, %v1099_v28 }
  0x98   :  { %847 = vmatprep.mubr.msk.bf16.mxu0 %vm242_vm4, %v223_v32  ;;  %vm181_vm9 = vcmp.eq.s32.totalorder %v171_v48, %v1099_v28  ;;  %v485_v32 = vrot.slane %v1095_v18, %v484_v31 }
  0x99   :  { %vm782_vm10 = vmpackc.low %vm182_vm8, %vm181_vm9 }
  0x9a   :  { %v180_v59 = vpop.permute.xlu1 %179 }
  0x9b   :  { %v177_v60 = vpop.permute.xlu0 %176  ;;  %vm184_vm11 = vcmp.eq.s32.totalorder %v180_v59, %v1099_v28 }
  0x9c   :  { %vm183_vm12 = vcmp.eq.s32.totalorder %v177_v60, %v1099_v28 }
  0x9d   :  { %vm784_vm13 = vmpackc.low %vm184_vm11, %vm183_vm12 }
  0x9f   :  { %v559_v16 = vpop.permute.xlu1 %558 }
  0xa0   :  { %vm569_vm15 = vcmp.eq.s32.totalorder %v559_v16, %v1099_v28 }
  0xdc   :  { %v96_v20 = vpop.f32.mrb[0].mxu1 }
  0xdd   :  { %v97_v21 = vadd.f32 %v96_v20, %v45_v19  ;;  %v835_v22 = vpop.f32.mrb[1].mxu1 }
  0xde   :  { %v99_v23 = vpop.f32.mrb[2].mxu1 }
  0xdf   :  { %v102_v24 = vmax.f32 %v97_v21, 0.0  ;;  %v836_v25 = vpop.f32.mrb[3].mxu1 }
  0xe1   :  { %v103_v26 = vpack.c.bf16 %v102_v24, %v102_v24 }
  0xe3   :  { %842 = vmatmul.mubr.msk.bf16.vlgmr.msra.gmra.mrb[4].mxu1 %vm58_vm1, %v103_v26 }
  0xe4   :  { %872 = vmatpush3.bf16.msra.mxu1 %v930_v33 }
  0xe5   :  { %873 = vmatprep.subr.bf16.mxu1 %v931_v61 }
  0xe8   :  { %874 = vmatpush3.bf16.msra.mxu1 %v931_v61  ;;  %v794_v61 = vsel %vm569_vm15, 1.0, %v988_v1 }
  0xe9   :  { %879 = vmatprep.subr.bf16.mxu1 %v932_v5 }
 0x1b6   :  { %v157_v38 = vpop.f32.mrb[4].mxu1 }
 0x1b7   :  { %v158_v39 = vadd.f32 %v157_v38, %v107_v36  ;;  %v843_v40 = vpop.f32.mrb[5].mxu1 }
 0x1b8   :  { %v160_v41 = vpop.f32.mrb[6].mxu1 }
 0x1b9   :  { %v241_v42 = vpack.c.bf16 %v158_v39, %v158_v39  ;;  %v844_v43 = vpop.f32.mrb[7].mxu1 }
 0x1bb   :  { %891 = vmatprep.subr.msk.bf16.mxu0 %vm249_vm7, %v241_v42  ;;  %v251_v49 = vsel %vm249_vm7, %v241_v42, 0 }
 0x1bc   :  { %846 = vmatpush3.bf16.msra.mxu0 %v251_v49 }
 0x1bd   :  { %851 = vmatprep.subr.bf16.mxu0 %v922_v44 }
 0x1bf   :  { %848 = vmatmul.mubr.msk.bf16.vlgmr.msra.gmra.mrb[0].mxu0 %vm242_vm4, %v224_v50  ;;  %vm583_vm4 = vcmp.ge.s32.totalorder %v1064_v6, 0 }
 0x1c0   :  { %852 = vmatpush3.bf16.msra.mxu0 %v922_v44  ;;  %867 = vmatprep.mubr.msk.bf16.mxu0 %vm782_vm10, %v991_v52 }
 0x1c1   :  { %853 = vmatprep.subr.bf16.mxu0 %v923_v51 }
 0x1c4   :  { %854 = vmatpush3.bf16.msra.mxu0 %v923_v51 }
 0x1c5   :  { %855 = vmatprep.subr.bf16.mxu0 %v924_v53 }
 0x1c8   :  { %856 = vmatpush3.bf16.msra.mxu0 %v924_v53 }
 0x1c9   :  { %857 = vmatprep.subr.bf16.mxu0 %v925_v54 }
 0x1cc   :  { %858 = vmatpush3.bf16.msra.mxu0 %v925_v54 }
 0x1cd   :  { %859 = vmatprep.subr.bf16.mxu0 %v926_v55 }
 0x1d0   :  { %860 = vmatpush3.bf16.msra.mxu0 %v926_v55 }
 0x1d1   :  { %861 = vmatprep.subr.bf16.mxu0 %v927_v56 }
 0x1d4   :  { %862 = vmatpush3.bf16.msra.mxu0 %v927_v56 }
 0x1d5   :  { %863 = vmatprep.subr.bf16.mxu0 %v928_v57 }
 0x1d8   :  { %864 = vmatpush3.bf16.msra.mxu0 %v928_v57 }
 0x1d9   :  { %865 = vmatprep.subr.bf16.mxu0 %v929_v58 }
 0x1dc   :  { %866 = vmatpush3.bf16.msra.mxu0 %v929_v58 }
 0x1df   :  { %868 = vmatmul.mubr.msk.bf16.vlgmr.msra.gmra.mrb[0].mxu0 %vm784_vm13, %v991_v52 }
 0x2b2   :  { %v869_v62 = vpop.f32.mrb[0].mxu0 }
 0x2b3   :  { %v384_v63 = vpop.f32.mrb[1].mxu0 }
 0x2b4   :  { %v870_v0 = vpop.f32.mrb[2].mxu0 }
 0x2b5   :  { %v400_v2 = vpack.c.bf16 %v870_v0, %v869_v62  ;;  %v387_v3 = vpop.f32.mrb[3].mxu0 }
 0x2b6   :  { %v399_v4 = vpack.c.bf16 %v387_v3, %v384_v63 }
 0x2b8   :  { %875 = vmatprep.mubr.msk.bf16.mxu1 %vm58_vm1, %v399_v4  ;;  %v800_v4 = vsel %vm583_vm4, 1.0, %v988_v1 }
 0x2b9   :  { %876 = vmatmul.mubr.msk.bf16.vlgmr.msra.gmra.mrb[8].mxu1 %vm58_vm1, %v400_v2 }
 0x2ba   :  { %880 = vmatpush3.bf16.msra.mxu1 %v932_v5  ;;  %v798_v5 = vsel %vm581_vm2, 1.0, %v988_v1 }
 0x2bb   :  { %881 = vmatprep.subr.bf16.mxu1 %v933_v9 }
 0x2be   :  { %882 = vmatpush3.bf16.msra.mxu1 %v933_v9  ;;  %v799_v9 = vsel %vm582_vm3, 1.0, %v988_v1 }
 0x38c   :  { %v877_v14 = vpop.f32.mrb[8].mxu1 }
 0x38d   :  { %v466_v15 = vadd.f32 %v877_v14, %v404_v13  ;;  %v457_v17 = vpop.f32.mrb[9].mxu1 }
 0x38e   :  { %v458_v19 = vadd.f32 %v457_v17, %v404_v13  ;;  %v878_v20 = vpop.f32.mrb[10].mxu1 }
 0x38f   :  { %v469_v21 = vadd.f32 %v878_v20, %v404_v13  ;;  %v460_v22 = vpop.f32.mrb[11].mxu1  ;;  %v474_v24 = vmax.f32 %v466_v15, 0.0 }
 0x390   :  { %v461_v23 = vadd.f32 %v460_v22, %v404_v13  ;;  %v472_v26 = vmax.f32 %v458_v19, 0.0 }
 0x391   :  { %v475_v25 = vmax.f32 %v469_v21, 0.0 }
 0x392   :  { %v473_v27 = vmax.f32 %v461_v23, 0.0 }
 0x393   :  { %v477_v29 = vpack.c.bf16 %v475_v25, %v474_v24 }
 0x394   :  { %v476_v30 = vpack.c.bf16 %v473_v27, %v472_v26 }
 0x396   :  { %883 = vmatprep.mubr.msk.bf16.mxu1 %vm58_vm1, %v476_v30 }
 0x397   :  { %884 = vmatmul.mubr.msk.bf16.vlgmr.msra.gmra.mrb[12].mxu1 %vm58_vm1, %v477_v29 }
 0x46a   :  { %v885_v33 = vpop.f32.mrb[12].mxu1 }
 0x46b   :  { %v547_v34 = vadd.f32 %v885_v33, %v485_v32  ;;  %v538_v35 = vpop.f32.mrb[13].mxu1 }
 0x46c   :  { %v539_v36 = vadd.f32 %v538_v35, %v485_v32  ;;  %v886_v37 = vpop.f32.mrb[14].mxu1 }
 0x46d   :  { %555 = vst [vmem:[#allocation2 + $0x10] sm:$0xff] %v547_v34  ;;  %v550_v38 = vadd.f32 %v886_v37, %v485_v32  ;;  %597 = vmax.xlane.f32.xlu0 %v547_v34  ;;  %v541_v39 = vpop.f32.mrb[15].mxu1 }
 0x46e   :  { %553 = vst [vmem:[#allocation2] sm:$0xff] %v539_v36  ;;  %v542_v40 = vadd.f32 %v541_v39, %v485_v32  ;;  %v633_v62 = vmul.f32 %v794_v61, %v539_v36  ;;  %v801_v32 = vsel %vm584_vm5, 1.0, %v988_v1 }
 0x46f   :  { %556 = vst [vmem:[#allocation2 + $0x18] sm:$0xff] %v550_v38 }
 0x470   :  { %554 = vst [vmem:[#allocation2 + $0x8] sm:$0xff] %v542_v40  ;;  %595 = vmax.xlane.f32.xlu1 %v542_v40 }
 0x471   :  { %593 = vmax.xlane.f32.xlu0 %v539_v36 }
 0x475   :  { %599 = vmax.xlane.f32.xlu0 %v550_v38 }
 0x481   :  { %564 = vperm.xlu1 %911, %v1064_v6  }
 0x485   :  { %567 = vperm.xlu1 %911, %v1074_v8  }
 0x48b   :  { %561 = vperm.xlu0 %912, %v1081_v12  }
 0x4fa   :  { %v1165_v18 = vpop.xlane.xlu0 %597 }
 0x4fb   :  { %v603_v44 = vsub.f32 %v547_v34, %v1165_v18 }
 0x4fd   :  { %v1167_v41 = vpop.xlane.xlu1 %595  ;;  %v609_v50 = vmul.f32 1.442695, %v603_v44 }
 0x4fe   :  { %v602_v42 = vsub.f32 %v542_v40, %v1167_v41  ;;  %v1170_v43 = vpop.xlane.xlu0 %593 }
 0x4ff   :  { %v601_v45 = vsub.f32 %v539_v36, %v1170_v43 }
 0x500   :  { %v607_v46 = vmul.f32 1.442695, %v602_v42 }
 0x501   :  { %v605_v47 = vmul.f32 1.442695, %v601_v45  ;;  %v565_v48 = vpop.permute.xlu1 %564 }
 0x502   :  { %934 = vpow2.f32 %v607_v46  ;;  %v1174_v49 = vpop.xlane.xlu0 %599  ;;  %vm571_vm1 = vcmp.eq.s32.totalorder %v565_v48, %v1099_v28 }
 0x503   :  { %936 = vpow2.f32 %v605_v47  ;;  %v604_v51 = vsub.f32 %v550_v38, %v1174_v49  ;;  %v796_v2 = vsel %vm571_vm1, 1.0, %v988_v1 }
 0x504   :  { %938 = vpow2.f32 %v609_v50  ;;  %v635_v3 = vmul.f32 %v796_v2, %v547_v34 }
 0x505   :  { %v568_v52 = vpop.permute.xlu1 %567  ;;  %v611_v53 = vmul.f32 1.442695, %v604_v51 }
 0x506   :  { %vm572_vm14 = vcmp.eq.s32.totalorder %v568_v52, %v1099_v28 }
 0x507   :  { %940 = vpow2.f32 %v611_v53  ;;  %v797_v55 = vsel %vm572_vm14, 1.0, %v988_v1 }
 0x508   :  { %v636_v57 = vmul.f32 %v797_v55, %v550_v38 }
 0x50a   :  { %v562_v59 = vpop.permute.xlu0 %561 }
 0x50b   :  { %vm570_vm0 = vcmp.eq.s32.totalorder %v562_v59, %v1099_v28  ;;  %v913_v28 = vpack.i.bf16 %v799_v9, %v798_v5 }
 0x50c   :  { %v935_v54 = vpop.eup %934  ;;  %v795_v63 = vsel %vm570_vm0, 1.0, %v988_v1 }
 0x50d   :  { %v937_v56 = vpop.eup %936  ;;  %615 = vadd.xlane.f32.xlu0 %v935_v54  ;;  %v634_v0 = vmul.f32 %v795_v63, %v542_v40 }
 0x50e   :  { %613 = vadd.xlane.f32.xlu1 %v937_v56  ;;  %v939_v58 = vpop.eup %938 }
 0x511   :  { %643 = vadd.xlane.f32.xlu0 %v636_v57  ;;  %v941_v60 = vpop.eup %940 }
 0x512   :  { %617 = vadd.xlane.f32.xlu1 %v939_v58 }
 0x516   :  { %619 = vadd.xlane.f32.xlu1 %v941_v60 }
 0x51a   :  { %637 = vadd.xlane.f32.xlu1 %v633_v62 }
 0x51e   :  { %639 = vadd.xlane.f32.xlu1 %v634_v0 }
 0x522   :  { %641 = vadd.xlane.f32.xlu1 %v635_v3 }
 0x527   :  { %694 = vrot.lane.b32.xlu0 %v800_v4, %s993_s4 }
 0x533   :  { %914 = vrot.lane.b32.xlu1 %v913_v28, %s993_s4 }
 0x59a   :  { %v616_v10 = vpop.xlane.xlu0 %615 }
 0x59b   :  { %942 = vlog2.f32 %v616_v10  ;;  %v614_v11 = vpop.xlane.xlu1 %613 }
 0x59c   :  { %944 = vlog2.f32 %v614_v11 }
 0x59e   :  { %v644_v36 = vpop.xlane.xlu0 %643 }
 0x59f   :  { %v618_v7 = vpop.xlane.xlu1 %617 }
 0x5a0   :  { %946 = vlog2.f32 %v618_v7 }
 0x5a2   :  { %v695_v1 = vpop.permute.xlu0 %694 }
 0x5a3   :  { %v620_v12 = vpop.xlane.xlu1 %619 }
 0x5a4   :  { %948 = vlog2.f32 %v620_v12 }
 0x5a5   :  { %v943_v6 = vpop.eup %942 }
 0x5a6   :  { %v624_v13 = vmul.f32 0.6931472, %v943_v6  ;;  %v945_v14 = vpop.eup %944 }
 0x5a7   :  { %v638_v15 = vpop.xlane.xlu1 %637  ;;  %v622_v19 = vmul.f32 0.6931472, %v945_v14 }
 0x5a8   :  { %v630_v20 = vadd.f32 %v624_v13, %v1167_v41 }
 0x5a9   :  { %v629_v26 = vadd.f32 %v622_v19, %v1170_v43  ;;  %v705_v43 = vsel %vm669_vm6, %v695_v1, 0.0 }
 0x5aa   :  { %v947_v17 = vpop.eup %946 }
 0x5ab   :  { %v626_v21 = vmul.f32 0.6931472, %v947_v17  ;;  %v640_v22 = vpop.xlane.xlu1 %639  ;;  %v645_v34 = vsub.f32 %v629_v26, %v638_v15 }
 0x5ac   :  { %v646_v23 = vsub.f32 %v630_v20, %v640_v22 }
 0x5ad   :  { %v631_v24 = vadd.f32 %v626_v21, %v1165_v18  ;;  %v649_v37 = vmul.f32 %v798_v5, %v645_v34 }
 0x5ae   :  { %v949_v25 = vpop.eup %948  ;;  %v650_v27 = vmul.f32 %v799_v9, %v646_v23 }
 0x5af   :  { %v628_v29 = vmul.f32 0.6931472, %v949_v25  ;;  %v642_v30 = vpop.xlane.xlu1 %641 }
 0x5b0   :  { %v647_v31 = vsub.f32 %v631_v24, %v642_v30  ;;  %659 = vrot.lane.b32.xlu0 %v650_v27, %s993_s4 }
 0x5b1   :  { %v632_v33 = vadd.f32 %v628_v29, %v1174_v49 }
 0x5b2   :  { %v651_v35 = vmul.f32 %v800_v4, %v647_v31 }
 0x5b3   :  { %v648_v38 = vsub.f32 %v632_v33, %v644_v36  ;;  %v915_v39 = vpop.permute.xlu1 %914 }
 0x5b4   :  { %696 = vrot.lane.b32.xlu0 %v801_v32, %s993_s4  ;;  %661 = vrot.lane.b32.xlu1 %v651_v35, %s993_s4  ;;  %v917_v40 = vunpack.i.h.bf16 %v915_v39  ;;  %v916_v16 = vunpack.i.l.bf16 %v915_v39 }
 0x5b5   :  { %v652_v8 = vmul.f32 %v801_v32, %v648_v38 }
 0x5b6   :  { %v703_v18 = vsel %vm669_vm6, %v917_v40, 0.0  ;;  %v702_v41 = vsel %vm669_vm6, %v916_v16, 0.0 }
 0x5b7   :  { %v704_v42 = vadd.f32 %v703_v18, %v702_v41 }
 0x5b8   :  { %657 = vrot.lane.b32.xlu1 %v649_v37, %s993_s4 }
 0x5b9   :  { %v706_v45 = vadd.f32 %v705_v43, %v704_v42 }
 0x5bc   :  { %663 = vrot.lane.b32.xlu1 %v652_v8, %s993_s4 }
 0x622   :  { %v660_v44 = vpop.permute.xlu0 %659 }
 0x623   :  { %v671_v51 = vsel %vm669_vm6, %v660_v44, 0.0 }
 0x626   :  { %v697_v46 = vpop.permute.xlu0 %696  ;;  %v662_v47 = vpop.permute.xlu1 %661 }
 0x627   :  { %v707_v48 = vsel %vm669_vm6, %v697_v46, 0.0  ;;  %v673_v54 = vsel %vm669_vm6, %v662_v47, 0.0 }
 0x628   :  { %v708_v49 = vadd.f32 %v707_v48, %v706_v45 }
 0x62a   :  { %v658_v50 = vpop.permute.xlu1 %657  ;;  %709 = vadd.xlane.f32.xlu0 %v708_v49 }
 0x62b   :  { %v670_v52 = vsel %vm669_vm6, %v658_v50, 0.0 }
 0x62c   :  { %v672_v53 = vadd.f32 %v671_v51, %v670_v52 }
 0x62e   :  { %v664_v55 = vpop.permute.xlu1 %663  ;;  %v674_v56 = vadd.f32 %v673_v54, %v672_v53 }
 0x62f   :  { %v675_v57 = vsel %vm669_vm6, %v664_v55, 0.0 }
 0x630   :  { %v676_v58 = vadd.f32 %v675_v57, %v674_v56 }
 0x632   :  { %677 = vadd.xlane.f32.xlu1 %v676_v58 }
 0x6b7   :  { %v710_v59 = vpop.xlane.xlu0 %709 }
 0x6b8   :  { %v711_v60 = vrot.slane %v710_v59, 4 }
 0x6ba   :  { %v712_v61 = vadd.f32 %v711_v60, %v710_v59 }
 0x6bc   :  { %v713_v62 = vrot.slane %v712_v61, 2 }
 0x6bf   :  { %v678_v63 = vpop.xlane.xlu1 %677 }
 0x6c0   :  { %v679_v0 = vrot.slane %v678_v63, 4 }
 0x6c2   :  { %v680_v2 = vadd.f32 %v679_v0, %v678_v63 }
 0x6c3   :  { %963 = shalt.err (!%p960_p4)
}
 0x6c4   :  { %s964_s19 = scalar_lea.hbm %s1242_s6, 512 }
 0x6c5   :  { %p965_p5 = scmp.ne.s32.totalorder %s1242_s6, %s964_s19  ;;  %p968_p6 = scmp.lt.u32.totalorder %s964_s19, %s1242_s6 }
 0x6c7   :  { %p970_p7 = pnand %p968_p6, %p965_p5 }
 0x6c9   :  { %973 = shalt.err (!%p970_p7)
}
 0x6ca   :  { %s995_s24 = smov 128   ;;  %s996_s25 = smov 8   ;;  %v714_v3 = vadd.f32 %v713_v62, %v712_v61  ;;  %v681_v4 = vrot.slane %v680_v2, 2 }
 0x6cb   :  { %736 = dma.vmem_to_hbm [thread:$0]  %s731_s17, 512, %s1242_s6, [#allocation3], %s995_s24, %s995_s24, %s996_s25  }
 0x6cc   :  { %v682_v5 = vadd.f32 %v681_v4, %v680_v2  ;;  %v715_v9 = vrot.slane %v714_v3, 1  ;;  %s997_s30 = smov 1.0   ;;  %s974_s11 = scalar_lea.hbm %s1243_s7, 16 }
 0x6cd   :  { %p975_p8 = scmp.ne.s32.totalorder %s1243_s7, %s974_s11  ;;  %p978_p9 = scmp.lt.u32.totalorder %s974_s11, %s1243_s7 }
 0x6ce   :  { %v683_v28 = vrot.slane %v682_v5, 1  ;;  %v716_v11 = vadd.f32 %v715_v9, %v714_v3 }
 0x6cf   :  { %p980_p10 = pnand %p978_p9, %p975_p8 }
 0x6d0   :  { %v684_v10 = vadd.f32 %v683_v28, %v682_v5 }
 0x6d2   :  { %892 = vpush %v684_v10 }
 0x6d3   :  { %894 = vpush %v716_v11 }
 0x703   :  { %s893_s28 = spop %892 }
 0x704   :  { %s895_s29 = spop %894 }
 0x705   :  { %s718_s8 = smax.f32 %s997_s30, %s895_s29 }
 0x706   :  { %v719_v7 = vstv %s718_s8 }
 0x707   :  { %950 = vrcp.f32 %v719_v7 }
 0x711   :  { %v951_v12 = vpop.eup %950 }
 0x712   :  { %896 = vpush %v951_v12 }
 0x743   :  { %s897_s9 = spop %896 }
 0x744   :  { %s722_s10 = smul.f32 %s897_s9, %s893_s28 }
 0x746   :  { %724 = sst [smem:[#allocation5]] %s722_s10 }
 0x747   :  { %983 = shalt.err (!%p980_p10)
}
 0x748   :  { %s998_s15 = smov [#allocation5]  }
 0x749   :  { %744 = dma.smem_to_hbm %s998_s15, 16, %s1243_s7, [#allocation4]  }
 0x74a   :  { %984 = dma.done.wait [#allocation3], 512  }
 0x74b   :  { %985 = vsyncadd [#allocation3], 4294966784 }
 0x74c   :  { %986 = dma.done.wait [#allocation4], 16  }
 0x74d   :  { %987 = vsyncadd [#allocation4], 4294967280 }
 0x74e   :  { %751 = sfence }
 0x74f   :  { %752 = vsyncpa [#allocation3], 1 }
 0x750   :  { %753 = vsyncpa [#allocation4], 1 }

</bundles_post_ra>
